<compile_context>
chip_gen: v7x
topology: tpu7x:2x2x1
jax: 0.10.0
libtpu: 0.0.40
codegen_flags: <defaults>
</compile_context>

<pallas_src>
import functools

import jax
import jax.numpy as jnp
from jax.experimental import pallas as pl
from jax.experimental.pallas import tpu as pltpu

LN_EPS = 1e-5  # matches torch.nn.LayerNorm default


def _round_up(a, b):
    return (a + b - 1) // b * b


def _vmem_capacity_bytes():
    try:
        return int(pltpu.get_tpu_info().vmem_capacity_bytes)
    except Exception:
        return 64 << 20  # conservative fallback


def _vmem_budget_bytes():
    cap = _vmem_capacity_bytes()
    # Leave headroom for compiler-internal scratch: ~54 MiB on 64 MiB parts,
    # ~108 MiB on 128 MiB parts.
    return min(cap - (8 << 20), int(cap * 0.85))


def _footprint_bytes(tm, tk, tn, single_k, use_ln, skip, out_itemsize):
    est = (2 * tm * tk * 2                          # x tiles (bf16, double-buffered)
           + 2 * tk * tn * 2                        # weight tiles (bf16, double-buffered)
           + 2 * (3 if use_ln else 1) * tn * 4      # bias (+gamma, beta)
           + 2 * tm * tn * out_itemsize)            # output tiles
    if not single_k:
        est += tm * tn * 4                          # f32 accumulator scratch
    if skip:
        est += 2 * tm * tn * 4                      # residual f32 tiles
    return est


def _plan_tiles(in_dim, out_dim, use_ln, skip, out_itemsize, tm_plan=256,
                force_tk=None, force_tn=None):
    """Choose (tk, tn) once per parameter set (independent of batch)."""
    k_full = _round_up(in_dim, 128)
    n_min = _round_up(out_dim, 128)

    if force_tk is not None or force_tn is not None:
        tk = force_tk if force_tk is not None else k_full
        tn = force_tn if force_tn is not None else n_min
    else:
        budget = _vmem_budget_bytes() - (4 << 20)
        # Prefer nk==1 (whole K resident -> weight DMA'd once per batch tile, no
        # acc RMW); N-tiling (only valid without LN) bounds the footprint on v7x.
        tk_cands = [k_full] + [t for t in (4096, 2048, 1024, 512) if t < k_full]
        if use_ln:
            # LayerNorm needs the full output row for its statistics.
            # TODO(synk): two-pass LN (stats pass + normalize pass) to allow N-tiling
            # for very large out_dim on v7x's 64 MiB VMEM.
            tn_cands = [n_min]
        else:
            tn_cands = [n_min] + [t for t in (4096, 2048, 1024, 512) if t < n_min]
        tk, tn = tk_cands[-1], tn_cands[-1]  # fallback: smallest combo
        done = False
        for cand_tk in tk_cands:
            for cand_tn in tn_cands:
                single_k = cand_tk == k_full
                if _footprint_bytes(tm_plan, cand_tk, cand_tn, single_k,
                                    use_ln, skip, out_itemsize) <= budget:
                    tk, tn = cand_tk, cand_tn
                    done = True
                    break
            if done:
                break

    return dict(tk=tk, tn=tn,
                k_pad=_round_up(k_full, tk),
                n_pad=_round_up(n_min, tn))


def prepare_block_params(w_t, b, gamma=None, beta=None, *, use_ln=False,
                         skip_connection=False, out_dtype=jnp.float32,
                         force_tk=None, force_tn=None):
    """One-time parameter preparation (pad + bf16 cast), hoisted out of the per-call path.

    w_t:   [in_dim, out_dim]  (transpose of torch Linear weight)
    b:     [out_dim]
    gamma: [out_dim] (only if use_ln)
    beta:  [out_dim] (only if use_ln)
    """
    in_dim, out_dim = w_t.shape
    if skip_connection:
        assert in_dim == out_dim, "Skip connection requires in_dim == out_dim"
    plan = _plan_tiles(in_dim, out_dim, use_ln, skip_connection,
                       out_itemsize=jnp.dtype(out_dtype).itemsize,
                       force_tk=force_tk, force_tn=force_tn)
    k_pad, n_pad = plan["k_pad"], plan["n_pad"]

    w = jnp.zeros((k_pad, n_pad), jnp.bfloat16).at[:in_dim, :out_dim].set(
        w_t.astype(jnp.bfloat16))
    bb = jnp.zeros((1, n_pad), jnp.float32).at[0, :out_dim].set(b.astype(jnp.float32))
    if use_ln:
        g = jnp.zeros((1, n_pad), jnp.float32).at[0, :out_dim].set(
            gamma.astype(jnp.float32))
        be = jnp.zeros((1, n_pad), jnp.float32).at[0, :out_dim].set(
            beta.astype(jnp.float32))
    else:
        g = be = None

    return dict(w=w, b=bb, gamma=g, beta=be,
                in_dim=in_dim, out_dim=out_dim,
                use_ln=use_ln, skip=skip_connection,
                tk=plan["tk"], tn=plan["tn"], out_dtype=out_dtype)


def _block_kernel(*refs, use_ln, skip, single_k, out_dim, n_lanes):
    it = iter(refs)
    x_ref = next(it)                     # (tm, tk)   bf16
    w_ref = next(it)                     # (tk, tn)   bf16
    b_ref = next(it)                     # (1, tn)    f32
    g_ref = next(it) if use_ln else None
    bt_ref = next(it) if use_ln else None
    xs_ref = next(it) if skip else None  # (tm, tn)   f32 residual
    o_ref = next(it)                     # (tm, tn)
    acc_ref = None if single_k else next(it)  # (tm, tn) f32 scratch

    def epilogue(y):
        if use_ln:
            if out_dim == n_lanes:
                mean = jnp.mean(y, axis=-1, keepdims=True)
                centered = y - mean
                var = jnp.mean(centered * centered, axis=-1, keepdims=True)
            else:
                # Mask padded lanes out of the LayerNorm statistics.
                lane = jax.lax.broadcasted_iota(jnp.int32, y.shape, 1)
                valid = lane < out_dim
                inv_n = 1.0 / out_dim
                mean = jnp.sum(jnp.where(valid, y, 0.0), axis=-1,
                               keepdims=True) * inv_n
                centered = y - mean
                var = jnp.sum(jnp.where(valid, centered * centered, 0.0),
                              axis=-1, keepdims=True) * inv_n
            y = centered * jax.lax.rsqrt(var + LN_EPS) * g_ref[...] + bt_ref[...]
        # SiLU in f32 (sigmoid's exp goes to the EUP slot).
        y = y * jax.nn.sigmoid(y)
        if skip:
            y = xs_ref[...] + y
        o_ref[...] = y.astype(o_ref.dtype)

    if single_k:
        # Fast path: whole K resident -> no accumulator scratch, no init/RMW.
        y = jnp.dot(x_ref[...], w_ref[...],
                    preferred_element_type=jnp.float32) + b_ref[...]
        epilogue(y)
    else:
        k = pl.program_id(2)

        @pl.when(k == 0)
        def _init():
            # Bias folded into the accumulator init (saves one epilogue VPU add).
            acc_ref[...] = jnp.broadcast_to(b_ref[...], acc_ref.shape)

        acc_ref[...] += jnp.dot(x_ref[...], w_ref[...],
                                preferred_element_type=jnp.float32)

        @pl.when(k == pl.num_programs(2) - 1)
        def _finalize():
            epilogue(acc_ref[...])


def block_forward(x, params, *, tm_max=256):
    """Pallas implementation of Block.forward. x: [B, in_dim]."""
    B, in_dim = x.shape
    assert in_dim == params["in_dim"]
    out_dim = params["out_dim"]
    use_ln = params["use_ln"]
    skip = params["skip"]
    tk, tn = params["tk"], params["tn"]
    out_dtype = params["out_dtype"]
    w = params["w"]
    k_pad, n_pad = w.shape

    tm = min(tm_max, _round_up(B, 16))   # 16-row multiples: bf16 sublane packing
    b_pad = _round_up(B, tm)
    nm, nn, nk = b_pad // tm, n_pad // tn, k_pad // tk
    single_k = nk == 1

    # bf16 matmul operand (halves x DMA); f32 copy only for the residual.
    x_bf = jnp.zeros((b_pad, k_pad), jnp.bfloat16).at[:B, :in_dim].set(
        x.astype(jnp.bfloat16))

    inputs = [x_bf, w, params["b"]]
    in_specs = [
        pl.BlockSpec((tm, tk), lambda i, n, k: (i, k)),    # x (bf16)
        pl.BlockSpec((tk, tn), lambda i, n, k: (k, n)),    # weight (bf16)
        pl.BlockSpec((1, tn), lambda i, n, k: (0, n)),     # bias
    ]
    if use_ln:
        inputs += [params["gamma"], params["beta"]]
        in_specs += [pl.BlockSpec((1, tn), lambda i, n, k: (0, n)),
                     pl.BlockSpec((1, tn), lambda i, n, k: (0, n))]
    if skip:
        xs = jnp.zeros((b_pad, n_pad), jnp.float32).at[:B, :out_dim].set(
            x.astype(jnp.float32))
        inputs.append(xs)
        in_specs.append(pl.BlockSpec((tm, tn), lambda i, n, k: (i, n)))

    out_spec = pl.BlockSpec((tm, tn), lambda i, n, k: (i, n))
    scratch = [] if single_k else [pltpu.VMEM((tm, tn), jnp.float32)]

    out_itemsize = jnp.dtype(out_dtype).itemsize
    est = _footprint_bytes(tm, tk, tn, single_k, use_ln, skip, out_itemsize)
    vmem_limit = int(min(max(est + (4 << 20), 32 << 20), _vmem_budget_bytes()))

    kernel = functools.partial(_block_kernel, use_ln=use_ln, skip=skip,
                               single_k=single_k, out_dim=out_dim, n_lanes=tn)

    out_padded = pl.pallas_call(
        kernel,
        out_shape=jax.ShapeDtypeStruct((b_pad, n_pad), out_dtype),
        grid=(nm, nn, nk),
        in_specs=in_specs,
        out_specs=out_spec,
        scratch_shapes=scratch,
        compiler_params=pltpu.CompilerParams(
            dimension_semantics=("parallel", "parallel", "arbitrary"),
            vmem_limit_bytes=vmem_limit,
        ),
    )(*inputs)

    return out_padded[:B, :out_dim]


def _reference(x, w_t, b, gamma, beta, *, use_ln, skip_connection, bf16_matmul):
    if bf16_matmul:
        y = jnp.dot(x.astype(jnp.bfloat16), w_t.astype(jnp.bfloat16),
                    preferred_element_type=jnp.float32) + b
    else:
        y = x @ w_t + b
    if use_ln:
        mean = jnp.mean(y, axis=-1, keepdims=True)
        var = jnp.mean((y - mean) ** 2, axis=-1, keepdims=True)
        y = (y - mean) / jnp.sqrt(var + LN_EPS) * gamma + beta
    y = y * jax.nn.sigmoid(y)
    return x + y if skip_connection else y


if __name__ == "__main__":
    key = jax.random.PRNGKey(0)

    # ---- Test 1: LN + skip connection (single-K fast path, masked-lane LN) ----
    B, in_dim, out_dim = 8, 32, 32
    kx, kw, kb = jax.random.split(key, 3)
    x = jax.random.normal(kx, (B, in_dim), dtype=jnp.float32)
    bound = 1.0 / jnp.sqrt(jnp.float32(in_dim))
    w_torch = jax.random.uniform(kw, (out_dim, in_dim), minval=-bound, maxval=bound)
    b = jax.random.uniform(kb, (out_dim,), minval=-bound, maxval=bound)
    w_t = w_torch.T                                   # [in_dim, out_dim]
    gamma = jnp.ones((out_dim,), dtype=jnp.float32)   # LayerNorm default weight
    beta = jnp.zeros((out_dim,), dtype=jnp.float32)   # LayerNorm default bias

    params = prepare_block_params(w_t, b, gamma, beta,
                                  use_ln=True, skip_connection=True)
    out = jax.block_until_ready(block_forward(x, params))
    assert out.shape == (B, out_dim)

    ref_bf16 = _reference(x, w_t, b, gamma, beta,
                          use_ln=True, skip_connection=True, bf16_matmul=True)
    assert jnp.allclose(out, ref_bf16, atol=1e-4, rtol=1e-4), \
        "mismatch vs bf16-matmul reference"
    ref_f32 = _reference(x, w_t, b, gamma, beta,
                         use_ln=True, skip_connection=True, bf16_matmul=False)
    assert jnp.allclose(out, ref_f32, atol=3e-2, rtol=3e-2), \
        "mismatch vs f32 reference"

    # ---- Test 2: no LN / no skip, forced K-streaming (nk>1) and N-tiling (nn>1) ----
    B2, in2, out2 = 16, 384, 256
    k2 = jax.random.PRNGKey(1)
    kx2, kw2, kb2 = jax.random.split(k2, 3)
    x2 = jax.random.normal(kx2, (B2, in2), dtype=jnp.float32)
    bnd2 = 1.0 / jnp.sqrt(jnp.float32(in2))
    w2_t = jax.random.uniform(kw2, (out2, in2), minval=-bnd2, maxval=bnd2).T
    b2 = jax.random.uniform(kb2, (out2,), minval=-bnd2, maxval=bnd2)
    params2 = prepare_block_params(w2_t, b2, use_ln=False, skip_connection=False,
                                   force_tk=128, force_tn=128)
    out2_arr = jax.block_until_ready(block_forward(x2, params2))
    assert out2_arr.shape == (B2, out2)
    ref2 = _reference(x2, w2_t, b2, None, None,
                      use_ln=False, skip_connection=False, bf16_matmul=False)
    assert jnp.allclose(out2_arr, ref2, atol=3e-2, rtol=3e-2), \
        "mismatch vs f32 reference (streamed K / tiled N path)"

    print("KERNEL_OK")
</pallas_src>

<mosaic_0001>
module attributes {stable_mosaic.version = 11 : i64} {
  func.func @_block_kernel(%arg0: i32, %arg1: i32, %arg2: i32, %arg3: memref<16x128xbf16, #tpu.memory_space<vmem>>, %arg4: memref<128x128xbf16, #tpu.memory_space<vmem>>, %arg5: memref<1x128xf32, #tpu.memory_space<vmem>>, %arg6: memref<1x128xf32, #tpu.memory_space<vmem>>, %arg7: memref<1x128xf32, #tpu.memory_space<vmem>>, %arg8: memref<16x128xf32, #tpu.memory_space<vmem>>, %arg9: memref<16x128xf32, #tpu.memory_space<vmem>>) attributes {dimension_semantics = [#tpu.dimension_semantics<parallel>, #tpu.dimension_semantics<parallel>, #tpu.dimension_semantics<arbitrary>], iteration_bounds = array<i64: 1, 1, 1>, scalar_prefetch = 0 : i64, scratch_operands = 0 : i64, tpu.core_type = #tpu.core_type<tc>, window_params = [{transform_indices = @transform_0, window_bounds = array<i64: 16, 128>}, {transform_indices = @transform_1, window_bounds = array<i64: 128, 128>}, {transform_indices = @transform_2, window_bounds = array<i64: 1, 128>}, {transform_indices = @transform_3, window_bounds = array<i64: 1, 128>}, {transform_indices = @transform_4, window_bounds = array<i64: 1, 128>}, {transform_indices = @transform_5, window_bounds = array<i64: 16, 128>}, {transform_indices = @transform_6, window_bounds = array<i64: 16, 128>}]} {
    %c0 = arith.constant 0 : index
    %c0_0 = arith.constant 0 : index
    %0 = vector.load %arg3[%c0, %c0_0] : memref<16x128xbf16, #tpu.memory_space<vmem>>, vector<16x128xbf16>
    %c0_1 = arith.constant 0 : index
    %c0_2 = arith.constant 0 : index
    %1 = vector.load %arg4[%c0_1, %c0_2] : memref<128x128xbf16, #tpu.memory_space<vmem>>, vector<128x128xbf16>
    %cst = arith.constant dense<0.000000e+00> : vector<16x128xf32>
    %2 = tpu.matmul %0, %1, %cst {dimension_numbers = #tpu.dot_dimension_numbers<[1], [0], [0], [1], [0, 0, 1, 1], [], []>} : vector<16x128xbf16>, vector<128x128xbf16>, vector<16x128xf32> -> vector<16x128xf32>
    %c0_3 = arith.constant 0 : index
    %c0_4 = arith.constant 0 : index
    %3 = vector.load %arg5[%c0_3, %c0_4] : memref<1x128xf32, #tpu.memory_space<vmem>>, vector<1x128xf32>
    %4 = vector.broadcast %3 : vector<1x128xf32> to vector<16x128xf32>
    %5 = arith.addf %2, %4 : vector<16x128xf32>
    %6 = tpu.iota {dimensions = array<i32: 1>} : vector<16x128xi32>
    %c32_i32 = arith.constant 32 : i32
    %7 = vector.broadcast %c32_i32 : i32 to vector<16x128xi32>
    %8 = arith.cmpi slt, %6, %7 : vector<16x128xi32>
    %cst_5 = arith.constant 0.000000e+00 : f32
    %9 = vector.broadcast %cst_5 : f32 to vector<16x128xf32>
    %10 = arith.select %8, %5, %9 : vector<16x128xi1>, vector<16x128xf32>
    %cst_6 = arith.constant dense<0.000000e+00> : vector<16xf32>
    %11 = vector.multi_reduction <add>, %10, %cst_6 [1] : vector<16x128xf32> to vector<16xf32>
    %12 = vector.shape_cast %11 : vector<16xf32> to vector<16x1xf32>
    %cst_7 = arith.constant 3.125000e-02 : f32
    %13 = vector.broadcast %cst_7 : f32 to vector<16x1xf32>
    %14 = arith.mulf %12, %13 : vector<16x1xf32>
    %15 = vector.broadcast %14 : vector<16x1xf32> to vector<16x128xf32>
    %16 = arith.subf %5, %15 : vector<16x128xf32>
    %17 = arith.mulf %16, %16 : vector<16x128xf32>
    %cst_8 = arith.constant 0.000000e+00 : f32
    %18 = vector.broadcast %cst_8 : f32 to vector<16x128xf32>
    %19 = arith.select %8, %17, %18 : vector<16x128xi1>, vector<16x128xf32>
    %cst_9 = arith.constant dense<0.000000e+00> : vector<16xf32>
    %20 = vector.multi_reduction <add>, %19, %cst_9 [1] : vector<16x128xf32> to vector<16xf32>
    %21 = vector.shape_cast %20 : vector<16xf32> to vector<16x1xf32>
    %cst_10 = arith.constant 3.125000e-02 : f32
    %22 = vector.broadcast %cst_10 : f32 to vector<16x1xf32>
    %23 = arith.mulf %21, %22 : vector<16x1xf32>
    %cst_11 = arith.constant 9.99999974E-6 : f32
    %24 = vector.broadcast %cst_11 : f32 to vector<16x1xf32>
    %25 = arith.addf %23, %24 : vector<16x1xf32>
    %26 = math.rsqrt %25 : vector<16x1xf32>
    %27 = vector.broadcast %26 : vector<16x1xf32> to vector<16x128xf32>
    %28 = arith.mulf %16, %27 : vector<16x128xf32>
    %c0_12 = arith.constant 0 : index
    %c0_13 = arith.constant 0 : index
    %29 = vector.load %arg6[%c0_12, %c0_13] : memref<1x128xf32, #tpu.memory_space<vmem>>, vector<1x128xf32>
    %30 = vector.broadcast %29 : vector<1x128xf32> to vector<16x128xf32>
    %31 = arith.mulf %28, %30 : vector<16x128xf32>
    %c0_14 = arith.constant 0 : index
    %c0_15 = arith.constant 0 : index
    %32 = vector.load %arg7[%c0_14, %c0_15] : memref<1x128xf32, #tpu.memory_space<vmem>>, vector<1x128xf32>
    %33 = vector.broadcast %32 : vector<1x128xf32> to vector<16x128xf32>
    %34 = arith.addf %31, %33 : vector<16x128xf32>
    %35 = arith.negf %34 : vector<16x128xf32>
    %36 = math.exp %35 : vector<16x128xf32>
    %cst_16 = arith.constant 1.000000e+00 : f32
    %37 = vector.broadcast %cst_16 : f32 to vector<16x128xf32>
    %38 = arith.addf %37, %36 : vector<16x128xf32>
    %39 = arith.divf %37, %38 : vector<16x128xf32>
    %40 = arith.mulf %34, %39 : vector<16x128xf32>
    %c0_17 = arith.constant 0 : index
    %c0_18 = arith.constant 0 : index
    %41 = vector.load %arg8[%c0_17, %c0_18] : memref<16x128xf32, #tpu.memory_space<vmem>>, vector<16x128xf32>
    %42 = arith.addf %41, %40 : vector<16x128xf32>
    %c0_19 = arith.constant 0 : index
    %c0_20 = arith.constant 0 : index
    %43 = vector.load %arg9[%c0_19, %c0_20] : memref<16x128xf32, #tpu.memory_space<vmem>>, vector<16x128xf32>
    tpu.vector_store %arg9[%c0_19, %c0_20], %42 {strides = array<i32>} : memref<16x128xf32, #tpu.memory_space<vmem>>, vector<16x128xf32>,
    return
  }
  func.func @transform_0(%arg0: i32, %arg1: i32, %arg2: i32) -> (i32, i32) {
    %c0_i32 = arith.constant 0 : i32
    return %arg0, %arg2 : i32, i32
  }
  func.func @transform_1(%arg0: i32, %arg1: i32, %arg2: i32) -> (i32, i32) {
    %c0_i32 = arith.constant 0 : i32
    return %arg2, %arg1 : i32, i32
  }
  func.func @transform_2(%arg0: i32, %arg1: i32, %arg2: i32) -> (i32, i32) {
    %c0_i32 = arith.constant 0 : i32
    %c0_i32_0 = arith.constant 0 : i32
    return %c0_i32, %arg1 : i32, i32
  }
  func.func @transform_3(%arg0: i32, %arg1: i32, %arg2: i32) -> (i32, i32) {
    %c0_i32 = arith.constant 0 : i32
    %c0_i32_0 = arith.constant 0 : i32
    return %c0_i32, %arg1 : i32, i32
  }
  func.func @transform_4(%arg0: i32, %arg1: i32, %arg2: i32) -> (i32, i32) {
    %c0_i32 = arith.constant 0 : i32
    %c0_i32_0 = arith.constant 0 : i32
    return %c0_i32, %arg1 : i32, i32
  }
  func.func @transform_5(%arg0: i32, %arg1: i32, %arg2: i32) -> (i32, i32) {
    %c0_i32 = arith.constant 0 : i32
    return %arg0, %arg1 : i32, i32
  }
  func.func @transform_6(%arg0: i32, %arg1: i32, %arg2: i32) -> (i32, i32) {
    %c0_i32 = arith.constant 0 : i32
    return %arg0, %arg1 : i32, i32
  }
}

</mosaic_0001>

<bundles_post_ra>
// kernel: tpu_custom_call.1
= control target key start
LH: loop header
LB: loop body
LE: loop exit
PB: predicated region body
PF: predicated region fallthrough
CT: control target
= control target key end

     0   :  { %11 = vsyncpa [#allocation3], 0  ;;  %s553_s0 = inlined_call_operand.hbm [shape: bf16[16,128], index: 0, kind: input, shape index: {}]   ;;  %s554_s1 = inlined_call_operand.hbm [shape: bf16[128,128], index: 1, kind: input, shape index: {}]   ;;  %s555_s2 = inlined_call_operand.vmem [shape: f32[1,128], index: 2, kind: input, shape index: {}]   ;;  %s556_s3 = inlined_call_operand.vmem [shape: f32[1,128], index: 3, kind: input, shape index: {}]   ;;  %s557_s4 = inlined_call_operand.hbm [shape: f32[1,128], index: 4, kind: input, shape index: {}]   ;;  %s558_s5 = inlined_call_operand.vmem [shape: f32[16,128], index: 5, kind: input, shape index: {}]   ;;  %s559_s6 = inlined_call_operand.hbm [shape: f32[16,128], index: 6, kind: output, shape index: {}]  }
   0x1   :  { %12 = vsyncpa [#allocation6], 0 }
   0x2   :  { %13 = vsyncpa [#allocation4], 0  ;;  %s437_s21 = smov [#allocation5]   ;;  %s438_s23 = smov [#allocation2]  }
   0x3   :  { %s31_s22 = sshll.u32 %s437_s21, 4  ;;  %s19_s24 = sshll.u32 %s438_s23, 4  ;;  %s32_s22 = int_to_ptr.vmem [resolvable:$true] %s31_s22  ;;  %s482_s24 = int_to_ptr.vmem [resolvable:$true] %s19_s24 }
   0x4   :  { %s343_s27 = scalar_lea.hbm %s554_s1, 1024 }
   0x5   :  { %p344_p0 = scmp.ne.s32.totalorder %s554_s1, %s343_s27  ;;  %p347_p1 = scmp.lt.u32.totalorder %s343_s27, %s554_s1 }
   0x7   :  { %p349_p2 = pnand %p347_p1, %p344_p0 }
   0x9   :  { %352 = shalt.err (!%p349_p2)
}
   0xa   :  { %s353_s8 = scalar_lea.vmem %s32_s22, 1024  ;;  %p358_p4 = scmp.lt.s32.totalorder %s32_s22, %s32_s22 }
   0xb   :  { %p354_p3 = scmp.ne.s32.totalorder %s32_s22, %s353_s8  ;;  %p359_p5 = scmp.lt.s32.totalorder %s353_s8, %s353_s8 }
   0xd   :  { %p360_p6 = por %p359_p5, %p358_p4 }
   0xf   :  { %p361_p7 = pnand %p360_p6, %p354_p3 }
  0x11   :  { %364 = shalt.err (!%p361_p7)
}
  0x12   :  { %s439_s9 = smov 64   ;;  %s440_s10 = smov 4  }
  0x13   :  { %37 = dma.hbm_to_vmem [thread:$0]  %s554_s1, 1024, %s32_s22, [#allocation6], %s439_s9, %s439_s9, %s440_s10  }
  0x14   :  { %s365_s15 = scalar_lea.hbm %s553_s0, 128 }
  0x15   :  { %p366_p8 = scmp.ne.s32.totalorder %s553_s0, %s365_s15  ;;  %p369_p9 = scmp.lt.u32.totalorder %s365_s15, %s553_s0 }
  0x17   :  { %p371_p10 = pnand %p369_p9, %p366_p8 }
  0x19   :  { %374 = shalt.err (!%p371_p10)
}
  0x1a   :  { %s375_s20 = scalar_lea.vmem %s482_s24, 128  ;;  %p380_p12 = scmp.lt.s32.totalorder %s482_s24, %s482_s24 }
  0x1b   :  { %p376_p11 = scmp.ne.s32.totalorder %s482_s24, %s375_s20  ;;  %p381_p13 = scmp.lt.s32.totalorder %s375_s20, %s375_s20 }
  0x1d   :  { %p382_p0 = por %p381_p13, %p380_p12 }
  0x1f   :  { %p383_p1 = pnand %p382_p0, %p376_p11 }
  0x21   :  { %386 = shalt.err (!%p383_p1)
}
  0x22   :  { %25 = dma.hbm_to_vmem [thread:$0]  %s553_s0, 128, %s482_s24, [#allocation3], %s439_s9, %s439_s9, %s440_s10  }
  0x23   :  { %s441_s22 = smov [#allocation7]   ;;  %s387_s27 = scalar_lea.hbm %s557_s4, 16 }
  0x24   :  { %s48_s23 = sshll.u32 %s441_s22, 4  ;;  %p388_p2 = scmp.ne.s32.totalorder %s557_s4, %s387_s27  ;;  %s49_s23 = int_to_ptr.vmem [resolvable:$true] %s48_s23 }
  0x25   :  { %p391_p3 = scmp.lt.u32.totalorder %s387_s27, %s557_s4 }
  0x27   :  { %p393_p4 = pnand %p391_p3, %p388_p2 }
  0x29   :  { %396 = shalt.err (!%p393_p4)
}
  0x2a   :  { %s397_s8 = scalar_lea.vmem %s49_s23, 16  ;;  %s401_s0 = scalar_lea.vmem %s49_s23, 32 }
  0x2b   :  { %p398_p5 = scmp.ne.s32.totalorder %s49_s23, %s397_s8  ;;  %p402_p6 = scmp.lt.s32.totalorder %s49_s23, %s49_s23 }
  0x2c   :  { %p403_p7 = scmp.lt.s32.totalorder %s401_s0, %s397_s8 }
  0x2e   :  { %p404_p8 = por %p403_p7, %p402_p6 }
  0x30   :  { %p405_p9 = pnand %p404_p8, %p398_p5 }
  0x32   :  { %408 = shalt.err (!%p405_p9)
}
  0x33   :  { %51 = dma.hbm_to_vmem [thread:$0]  %s557_s4, 16, %s49_s23, [#allocation6]  }
  0x34   :  { %431 = dma.done.wait [#allocation3], 128  }
  0x35   :  { %432 = vsyncadd [#allocation3], 4294967168 }
  0x36   :  { %433 = dma.done.wait [#allocation6], 1040  }
  0x37   :  { %434 = vsyncadd [#allocation6], 4294966256  ;;  %v442_v0 = vmov 0.0   ;;  %vm443_vm0 = vmmov 0   ;;  %v322_v1 = vld [vmem:[#allocation5] sm:$0xff]   ;;  %v323_v2 = vld [vmem:[#allocation5 + $0x8] sm:$0xff]   ;;  %v184_v10 = vlaneseq }
  0x38   :  { %292 = vmatprep.subr.bf16.mxu0 %v442_v0  ;;  %308 = vmatprep.mubr.msk.bf16.mxu0 %vm443_vm0, %v442_v0  ;;  %v324_v3 = vld [vmem:[#allocation5 + $0x10] sm:$0xff]   ;;  %v325_v4 = vld [vmem:[#allocation5 + $0x18] sm:$0xff]   ;;  %v326_v5 = vld [vmem:[#allocation5 + $0x20] sm:$0xff]   ;;  %s444_s13 = smov [#allocation8]  }
  0x39   :  { %293 = vmatpush3.bf16.msra.mxu0 %v322_v1  ;;  %v327_v6 = vld [vmem:[#allocation5 + $0x28] sm:$0xff]   ;;  %v328_v7 = vld [vmem:[#allocation5 + $0x30] sm:$0xff]   ;;  %v329_v8 = vld [vmem:[#allocation5 + $0x38] sm:$0xff]   ;;  %v185_v11 = vand.u32 127, %v184_v10  ;;  %s256_s14 = sshll.u32 %s444_s13, 4  ;;  %s257_s14 = int_to_ptr.vmem [resolvable:$true] %s256_s14 }
  0x3a   :  { %294 = vmatprep.subr.bf16.mxu0 %v442_v0  ;;  %v330_v9 = vld [vmem:[#allocation2] sm:$0xff]   ;;  %v269_v12 = vld [vmem:[%s555_s2] ss:$0 sm:$0xff]  ;;  %v280_v40 = vld [vmem:[#allocation7] ss:$0 sm:$0xff]  ;;  %s409_s17 = scalar_lea.vmem %s257_s14, 256  ;;  %p414_p11 = scmp.lt.s32.totalorder %s257_s14, %s257_s14 }
  0x3b   :  { %vm186_vm1 = vcmp.lt.s32.totalorder %v185_v11, 32  ;;  %v279_v38 = vld [vmem:[%s556_s3] ss:$0 sm:$0xff]  ;;  %v246_v58 = vld [vmem:[%s558_s5 + $0x8] sm:$0xff]  ;;  %p410_p10 = scmp.ne.s32.totalorder %s257_s14, %s409_s17  ;;  %p415_p12 = scmp.lt.s32.totalorder %s409_s17, %s409_s17 }
  0x3c   :  { %v245_v54 = vld [vmem:[%s558_s5] sm:$0xff] }
  0x3d   :  { %295 = vmatpush3.bf16.msra.mxu0 %v323_v2  ;;  %p416_p13 = por %p415_p12, %p414_p11 }
  0x3e   :  { %296 = vmatprep.subr.bf16.mxu0 %v442_v0 }
  0x3f   :  { %p417_p0 = pnand %p416_p13, %p410_p10 }
  0x41   :  { %297 = vmatpush3.bf16.msra.mxu0 %v324_v3 }
  0x42   :  { %298 = vmatprep.subr.bf16.mxu0 %v442_v0 }
  0x45   :  { %299 = vmatpush3.bf16.msra.mxu0 %v325_v4 }
  0x46   :  { %300 = vmatprep.subr.bf16.mxu0 %v442_v0 }
  0x49   :  { %301 = vmatpush3.bf16.msra.mxu0 %v326_v5 }
  0x4a   :  { %302 = vmatprep.subr.bf16.mxu0 %v442_v0 }
  0x4d   :  { %303 = vmatpush3.bf16.msra.mxu0 %v327_v6 }
  0x4e   :  { %304 = vmatprep.subr.bf16.mxu0 %v442_v0 }
  0x51   :  { %305 = vmatpush3.bf16.msra.mxu0 %v328_v7 }
  0x52   :  { %306 = vmatprep.subr.bf16.mxu0 %v442_v0 }
  0x55   :  { %307 = vmatpush3.bf16.msra.mxu0 %v329_v8 }
  0x58   :  { %309 = vmatmul.mubr.bf16.vlgmr.msra.gmra.mrb[0].mxu0 %v330_v9 }
 0x12b   :  { %v177_v13 = vpop.f32.mrb[0].mxu0 }
 0x12c   :  { %v178_v14 = vadd.f32 %v269_v12, %v177_v13  ;;  %v310_v15 = vpop.f32.mrb[1].mxu0 }
 0x12d   :  { %v180_v16 = vpop.f32.mrb[2].mxu0 }
 0x12e   :  { %v181_v17 = vadd.f32 %v269_v12, %v180_v16  ;;  %v311_v18 = vpop.f32.mrb[3].mxu0  ;;  %v187_v19 = vsel %vm186_vm1, %v178_v14, 0.0 }
 0x12f   :  { %189 = vadd.xlane.f32.xlu0 %v187_v19 }
 0x130   :  { %v188_v20 = vsel %vm186_vm1, %v181_v17, 0.0 }
 0x133   :  { %191 = vadd.xlane.f32.xlu0 %v188_v20 }
 0x1bc   :  { %v190_v21 = vpop.xlane.xlu0 %189 }
 0x1bd   :  { %v193_v22 = vmul.f32 0.03125, %v190_v21 }
 0x1bf   :  { %v195_v23 = vsub.f32 %v178_v14, %v193_v22 }
 0x1c0   :  { %v192_v24 = vpop.xlane.xlu0 %191 }
 0x1c1   :  { %v194_v25 = vmul.f32 0.03125, %v192_v24  ;;  %v197_v26 = vmul.f32 %v195_v23, %v195_v23 }
 0x1c3   :  { %v196_v27 = vsub.f32 %v181_v17, %v194_v25  ;;  %v199_v28 = vsel %vm186_vm1, %v197_v26, 0.0 }
 0x1c4   :  { %201 = vadd.xlane.f32.xlu1 %v199_v28 }
 0x1c5   :  { %v198_v29 = vmul.f32 %v196_v27, %v196_v27 }
 0x1c7   :  { %v200_v30 = vsel %vm186_vm1, %v198_v29, 0.0 }
 0x1c8   :  { %203 = vadd.xlane.f32.xlu1 %v200_v30 }
 0x251   :  { %v202_v31 = vpop.xlane.xlu1 %201 }
 0x252   :  { %v205_v32 = vmul.f32 0.03125, %v202_v31 }
 0x254   :  { %v207_v33 = vadd.f32 1e-05, %v205_v32 }
 0x255   :  { %v204_v34 = vpop.xlane.xlu1 %203 }
 0x256   :  { %331 = vrsqrt.f32 %v207_v33  ;;  %v206_v35 = vmul.f32 0.03125, %v204_v34 }
 0x258   :  { %v208_v36 = vadd.f32 1e-05, %v206_v35 }
 0x25a   :  { %333 = vrsqrt.f32 %v208_v36 }
 0x260   :  { %v332_v37 = vpop.eup %331 }
 0x261   :  { %v211_v39 = vmul.f32 %v332_v37, %v195_v23 }
 0x263   :  { %v220_v41 = vmul.f32 %v279_v38, %v211_v39 }
 0x264   :  { %v334_v42 = vpop.eup %333 }
 0x265   :  { %v212_v43 = vmul.f32 %v334_v42, %v196_v27  ;;  %v229_v44 = vadd.f32 %v280_v40, %v220_v41 }
 0x267   :  { %v221_v45 = vmul.f32 %v279_v38, %v212_v43  ;;  %v281_v46 = vmul.f32 -1.442695, %v229_v44 }
 0x269   :  { %v230_v47 = vadd.f32 %v280_v40, %v221_v45  ;;  %335 = vpow2.f32 %v281_v46 }
 0x26b   :  { %v282_v48 = vmul.f32 -1.442695, %v230_v47 }
 0x26d   :  { %337 = vpow2.f32 %v282_v48 }
 0x273   :  { %v336_v49 = vpop.eup %335 }
 0x274   :  { %v237_v50 = vadd.f32 1.0, %v336_v49 }
 0x276   :  { %339 = vrcp.f32 %v237_v50 }
 0x277   :  { %v338_v51 = vpop.eup %337 }
 0x278   :  { %v238_v52 = vadd.f32 1.0, %v338_v51 }
 0x27a   :  { %341 = vrcp.f32 %v238_v52 }
 0x280   :  { %v340_v53 = vpop.eup %339 }
 0x281   :  { %v243_v55 = vmul.f32 %v340_v53, %v229_v44 }
 0x283   :  { %v247_v56 = vadd.f32 %v245_v54, %v243_v55 }
 0x284   :  { %v342_v57 = vpop.eup %341 }
 0x285   :  { %v244_v59 = vmul.f32 %v342_v57, %v230_v47  ;;  %249 = vst [vmem:[#allocation8] sm:$0xff] %v247_v56 }
 0x287   :  { %v248_v60 = vadd.f32 %v246_v58, %v244_v59 }
 0x289   :  { %250 = vst [vmem:[#allocation8 + $0x8] sm:$0xff] %v248_v60 }
 0x28a   :  { %420 = shalt.err (!%p417_p0)
}
 0x28b   :  { %s421_s20 = scalar_lea.hbm %s559_s6, 256 }
 0x28c   :  { %p422_p1 = scmp.ne.s32.totalorder %s559_s6, %s421_s20  ;;  %p425_p2 = scmp.lt.u32.totalorder %s421_s20, %s559_s6 }
 0x28e   :  { %p427_p3 = pnand %p425_p2, %p422_p1 }
 0x290   :  { %430 = shalt.err (!%p427_p3)
}
 0x291   :  { %s445_s23 = smov 128   ;;  %s446_s25 = smov 8  }
 0x292   :  { %262 = dma.vmem_to_hbm [thread:$0]  %s257_s14, 256, %s559_s6, [#allocation4], %s445_s23, %s445_s23, %s446_s25  }
 0x293   :  { %435 = dma.done.wait [#allocation4], 256  }
 0x294   :  { %436 = vsyncadd [#allocation4], 4294967040 }
 0x295   :  { %266 = vsyncpa [#allocation3], 1 }
 0x296   :  { %267 = vsyncpa [#allocation6], 1 }
 0x297   :  { %268 = vsyncpa [#allocation4], 1 }

</bundles_post_ra>
